<compile_context>
chip_gen: v6e
topology: v6e:2x2x1
jax: 0.10.0
libtpu: 0.0.40
codegen_flags: <defaults>
</compile_context>

<pallas_src>
import jax
import jax.numpy as jnp
from jax.experimental import pallas as pl
from jax.experimental.pallas import tpu as pltpu


LAYER_SIZES = [6, 40, 81, 36, 19, 2]  # fc1, fc2, fc3, fc4, out
DEFAULT_TILE_B = 2048                 # lane-aligned batch tile; sweepable
LANE = 128


def _round_up(n, m):
    return ((n + m - 1) // m) * m


def mlp_kernel(x_ref,
               w1_ref, b1_ref,
               w2_ref, b2_ref,
               w3_ref, b3_ref,
               w4_ref, b4_ref,
               w5_ref, b5_ref,
               o_ref):
    """Feature-major MLP: activations are (features, TILE_B)."""

    def layer(w_ref, b_ref, h_bf16, relu):
        # bf16 x bf16 -> single MXU pass with f32 accumulation;
        # bias-add (+ ReLU) in f32 on the VPU (v5e-safe).
        a = jnp.dot(w_ref[...], h_bf16,
                    preferred_element_type=jnp.float32) + b_ref[...]
        if relu:
            a = jnp.maximum(a, 0.0)
        return a

    # In-kernel cast of the f32 input tile to bf16 (VPU, free under DMA).
    h = x_ref[...].astype(jnp.bfloat16)                     # (6,  tb)
    h = layer(w1_ref, b1_ref, h, True).astype(jnp.bfloat16)  # (40, tb)
    h = layer(w2_ref, b2_ref, h, True).astype(jnp.bfloat16)  # (81, tb)
    h = layer(w3_ref, b3_ref, h, True).astype(jnp.bfloat16)  # (36, tb)
    h = layer(w4_ref, b4_ref, h, True).astype(jnp.bfloat16)  # (19, tb)
    o_ref[...] = layer(w5_ref, b5_ref, h, False)             # (2,  tb) f32


def init_params(key):
    """Deterministic init matching PyTorch nn.Linear default:
    U(-1/sqrt(fan_in), 1/sqrt(fan_in)). Weights kept in PyTorch (out, in)
    layout; biases as (out, 1) columns."""
    params = []
    for fan_in, fan_out in zip(LAYER_SIZES[:-1], LAYER_SIZES[1:]):
        kw, kb, key = jax.random.split(key, 3)
        bound = 1.0 / (fan_in ** 0.5)
        w = jax.random.uniform(kw, (fan_out, fan_in), jnp.float32,
                               minval=-bound, maxval=bound)
        b = jax.random.uniform(kb, (fan_out, 1), jnp.float32,
                               minval=-bound, maxval=bound)
        params.append((w, b))
    return params


def _choose_tile(batch, tile_b):
    """Lane-aligned batch tile; keep >=2 grid steps when possible (v7x)."""
    b_min = _round_up(batch, LANE)
    tb = min(_round_up(tile_b, LANE), b_min)
    n_tiles = -(-b_min // tb)
    if n_tiles == 1 and tb > LANE:
        # Split so both v7x TensorCores get work (no-op effect on v5e/v6e).
        tb = _round_up(-(-tb // 2), LANE)
    b_pad = _round_up(batch, tb)
    return tb, b_pad


def _vmem_bytes_estimate(tb):
    """Rough per-core VMEM footprint for the chosen tile (with padding)."""
    def pad8(n):
        return _round_up(n, 8)
    total = 0
    total += pad8(LAYER_SIZES[0]) * tb * 4 * 2     # x block f32, double-buffered
    total += pad8(LAYER_SIZES[-1]) * tb * 4 * 2    # out block f32, double-buffered
    for fi, fo in zip(LAYER_SIZES[:-1], LAYER_SIZES[1:]):
        total += pad8(fo) * _round_up(fi, LANE) * 2 * 2   # bf16 weights (x2 bufs)
        total += pad8(fo) * LANE * 4 * 2                  # f32 biases (x2 bufs)
    for f in LAYER_SIZES[1:]:
        total += pad8(f) * tb * (4 + 2)            # f32 + bf16 activations
    return total


def network_forward(x, params, tile_b=DEFAULT_TILE_B):
    batch = x.shape[0]
    in_dim = LAYER_SIZES[0]
    out_dim = LAYER_SIZES[-1]

    tb, b_pad = _choose_tile(batch, tile_b)
    grid = (b_pad // tb,)

    # Feature-major input: (in_dim, B_pad), f32 (cast to bf16 in-kernel).
    x_t = jnp.transpose(x)
    if b_pad != batch:
        x_t = jnp.pad(x_t, ((0, 0), (0, b_pad - batch)))

    flat_params = []
    for w, b in params:
        flat_params.append(w.astype(jnp.bfloat16))  # (out, in) bf16
        flat_params.append(b)                       # (out, 1)  f32

    # x/out tiled along the lane (batch) axis; weights/biases VMEM-resident.
    in_specs = [pl.BlockSpec((in_dim, tb), lambda i: (0, i))]
    for p in flat_params:
        in_specs.append(pl.BlockSpec(p.shape, lambda i: (0, 0)))
    out_spec = pl.BlockSpec((out_dim, tb), lambda i: (0, i))

    flops = 2 * b_pad * sum(a * b for a, b in
                            zip(LAYER_SIZES[:-1], LAYER_SIZES[1:]))
    bytes_accessed = (int(x_t.size) * 4                      # x read (f32)
                      + b_pad * out_dim * 4                  # out write (f32)
                      + sum(int(p.size) * p.dtype.itemsize for p in flat_params))

    vmem_limit = int(min(max(2 * _vmem_bytes_estimate(tb), 32 << 20), 48 << 20))

    out_t = pl.pallas_call(
        mlp_kernel,
        out_shape=jax.ShapeDtypeStruct((out_dim, b_pad), jnp.float32),
        grid_spec=pltpu.PrefetchScalarGridSpec(
            num_scalar_prefetch=0,
            grid=grid,
            in_specs=in_specs,
            out_specs=out_spec,
        ),
        compiler_params=pltpu.CompilerParams(
            dimension_semantics=("parallel",),
            vmem_limit_bytes=vmem_limit),
        cost_estimate=pl.CostEstimate(
            flops=flops, transcendentals=0, bytes_accessed=bytes_accessed),
    )(x_t, *flat_params)

    # Back to PyTorch's (batch, out_dim) orientation; drop padded rows.
    return jnp.transpose(out_t[:, :batch])


def reference_forward_matched(x, params):
    """Same numerics as the kernel: bf16 matmul operands, f32 accumulation."""
    h = x.astype(jnp.bfloat16)
    for i, (w, b) in enumerate(params):
        h = jnp.dot(h, jnp.transpose(w.astype(jnp.bfloat16)),
                    preferred_element_type=jnp.float32) + b[:, 0]
        if i < len(params) - 1:
            h = jnp.maximum(h, 0.0).astype(jnp.bfloat16)
    return h


def reference_forward_f32(x, params):
    """Pure f32 reference (PyTorch-module semantics)."""
    h = x
    for i, (w, b) in enumerate(params):
        h = h @ jnp.transpose(w) + b[:, 0]
        if i < len(params) - 1:
            h = jnp.maximum(h, 0.0)
    return h


if __name__ == "__main__":
    key = jax.random.PRNGKey(0)
    k_x, k_p = jax.random.split(key)

    batch = 8
    x = jax.random.normal(k_x, (batch, LAYER_SIZES[0]), jnp.float32)
    params = init_params(k_p)

    out = jax.block_until_ready(network_forward(x, params))
    assert out.shape == (batch, LAYER_SIZES[-1]), out.shape

    # Tight check against a numerics-matched (bf16-operand) reference.
    ref_matched = reference_forward_matched(x, params)
    assert jnp.allclose(out, ref_matched, atol=1e-2, rtol=1e-2), \
        "mismatch vs bf16-matched reference"

    # Loose sanity check against the pure-f32 PyTorch-equivalent reference.
    ref_f32 = reference_forward_f32(x, params)
    assert jnp.allclose(out, ref_f32, atol=1e-1, rtol=1e-1), \
        "mismatch vs f32 reference"

    print("KERNEL_OK")
</pallas_src>

<mosaic_0001>
module attributes {stable_mosaic.version = 11 : i64} {
  func.func @mlp_kernel(%arg0: i32, %arg1: memref<6x128xf32, #tpu.memory_space<vmem>>, %arg2: memref<40x6xbf16, #tpu.memory_space<vmem>>, %arg3: memref<40x1xf32, #tpu.memory_space<vmem>>, %arg4: memref<81x40xbf16, #tpu.memory_space<vmem>>, %arg5: memref<81x1xf32, #tpu.memory_space<vmem>>, %arg6: memref<36x81xbf16, #tpu.memory_space<vmem>>, %arg7: memref<36x1xf32, #tpu.memory_space<vmem>>, %arg8: memref<19x36xbf16, #tpu.memory_space<vmem>>, %arg9: memref<19x1xf32, #tpu.memory_space<vmem>>, %arg10: memref<2x19xbf16, #tpu.memory_space<vmem>>, %arg11: memref<2x1xf32, #tpu.memory_space<vmem>>, %arg12: memref<2x128xf32, #tpu.memory_space<vmem>>) attributes {dimension_semantics = [#tpu.dimension_semantics<parallel>], iteration_bounds = array<i64: 1>, scalar_prefetch = 0 : i64, scratch_operands = 0 : i64, tpu.core_type = #tpu.core_type<tc>, window_params = [{transform_indices = @transform_0, window_bounds = array<i64: 6, 128>}, {pipeline_mode = #tpu.pipeline_mode<synchronous>, transform_indices = @transform_1, window_bounds = array<i64: 40, 6>}, {pipeline_mode = #tpu.pipeline_mode<synchronous>, transform_indices = @transform_2, window_bounds = array<i64: 40, 1>}, {pipeline_mode = #tpu.pipeline_mode<synchronous>, transform_indices = @transform_3, window_bounds = array<i64: 81, 40>}, {pipeline_mode = #tpu.pipeline_mode<synchronous>, transform_indices = @transform_4, window_bounds = array<i64: 81, 1>}, {pipeline_mode = #tpu.pipeline_mode<synchronous>, transform_indices = @transform_5, window_bounds = array<i64: 36, 81>}, {pipeline_mode = #tpu.pipeline_mode<synchronous>, transform_indices = @transform_6, window_bounds = array<i64: 36, 1>}, {pipeline_mode = #tpu.pipeline_mode<synchronous>, transform_indices = @transform_7, window_bounds = array<i64: 19, 36>}, {pipeline_mode = #tpu.pipeline_mode<synchronous>, transform_indices = @transform_8, window_bounds = array<i64: 19, 1>}, {pipeline_mode = #tpu.pipeline_mode<synchronous>, transform_indices = @transform_9, window_bounds = array<i64: 2, 19>}, {pipeline_mode = #tpu.pipeline_mode<synchronous>, transform_indices = @transform_10, window_bounds = array<i64: 2, 1>}, {transform_indices = @transform_11, window_bounds = array<i64: 2, 128>}]} {
    %c0 = arith.constant 0 : index
    %c0_0 = arith.constant 0 : index
    %0 = vector.load %arg1[%c0, %c0_0] : memref<6x128xf32, #tpu.memory_space<vmem>>, vector<6x128xf32>
    %1 = arith.truncf %0 : vector<6x128xf32> to vector<6x128xbf16>
    %c0_1 = arith.constant 0 : index
    %c0_2 = arith.constant 0 : index
    %2 = vector.load %arg2[%c0_1, %c0_2] : memref<40x6xbf16, #tpu.memory_space<vmem>>, vector<40x6xbf16>
    %cst = arith.constant dense<0.000000e+00> : vector<40x128xf32>
    %3 = tpu.matmul %2, %1, %cst {dimension_numbers = #tpu.dot_dimension_numbers<[1], [0], [0], [1], [0, 0, 1, 1], [], []>} : vector<40x6xbf16>, vector<6x128xbf16>, vector<40x128xf32> -> vector<40x128xf32>
    %c0_3 = arith.constant 0 : index
    %c0_4 = arith.constant 0 : index
    %4 = vector.load %arg3[%c0_3, %c0_4] : memref<40x1xf32, #tpu.memory_space<vmem>>, vector<40x1xf32>
    %5 = vector.broadcast %4 : vector<40x1xf32> to vector<40x128xf32>
    %6 = arith.addf %3, %5 : vector<40x128xf32>
    %cst_5 = arith.constant 0.000000e+00 : f32
    %7 = vector.broadcast %cst_5 : f32 to vector<40x128xf32>
    %8 = arith.maximumf %6, %7 : vector<40x128xf32>
    %9 = arith.truncf %8 : vector<40x128xf32> to vector<40x128xbf16>
    %c0_6 = arith.constant 0 : index
    %c0_7 = arith.constant 0 : index
    %10 = vector.load %arg4[%c0_6, %c0_7] : memref<81x40xbf16, #tpu.memory_space<vmem>>, vector<81x40xbf16>
    %cst_8 = arith.constant dense<0.000000e+00> : vector<81x128xf32>
    %11 = tpu.matmul %10, %9, %cst_8 {dimension_numbers = #tpu.dot_dimension_numbers<[1], [0], [0], [1], [0, 0, 1, 1], [], []>} : vector<81x40xbf16>, vector<40x128xbf16>, vector<81x128xf32> -> vector<81x128xf32>
    %c0_9 = arith.constant 0 : index
    %c0_10 = arith.constant 0 : index
    %12 = vector.load %arg5[%c0_9, %c0_10] : memref<81x1xf32, #tpu.memory_space<vmem>>, vector<81x1xf32>
    %13 = vector.broadcast %12 : vector<81x1xf32> to vector<81x128xf32>
    %14 = arith.addf %11, %13 : vector<81x128xf32>
    %cst_11 = arith.constant 0.000000e+00 : f32
    %15 = vector.broadcast %cst_11 : f32 to vector<81x128xf32>
    %16 = arith.maximumf %14, %15 : vector<81x128xf32>
    %17 = arith.truncf %16 : vector<81x128xf32> to vector<81x128xbf16>
    %c0_12 = arith.constant 0 : index
    %c0_13 = arith.constant 0 : index
    %18 = vector.load %arg6[%c0_12, %c0_13] : memref<36x81xbf16, #tpu.memory_space<vmem>>, vector<36x81xbf16>
    %cst_14 = arith.constant dense<0.000000e+00> : vector<36x128xf32>
    %19 = tpu.matmul %18, %17, %cst_14 {dimension_numbers = #tpu.dot_dimension_numbers<[1], [0], [0], [1], [0, 0, 1, 1], [], []>} : vector<36x81xbf16>, vector<81x128xbf16>, vector<36x128xf32> -> vector<36x128xf32>
    %c0_15 = arith.constant 0 : index
    %c0_16 = arith.constant 0 : index
    %20 = vector.load %arg7[%c0_15, %c0_16] : memref<36x1xf32, #tpu.memory_space<vmem>>, vector<36x1xf32>
    %21 = vector.broadcast %20 : vector<36x1xf32> to vector<36x128xf32>
    %22 = arith.addf %19, %21 : vector<36x128xf32>
    %cst_17 = arith.constant 0.000000e+00 : f32
    %23 = vector.broadcast %cst_17 : f32 to vector<36x128xf32>
    %24 = arith.maximumf %22, %23 : vector<36x128xf32>
    %25 = arith.truncf %24 : vector<36x128xf32> to vector<36x128xbf16>
    %c0_18 = arith.constant 0 : index
    %c0_19 = arith.constant 0 : index
    %26 = vector.load %arg8[%c0_18, %c0_19] : memref<19x36xbf16, #tpu.memory_space<vmem>>, vector<19x36xbf16>
    %cst_20 = arith.constant dense<0.000000e+00> : vector<19x128xf32>
    %27 = tpu.matmul %26, %25, %cst_20 {dimension_numbers = #tpu.dot_dimension_numbers<[1], [0], [0], [1], [0, 0, 1, 1], [], []>} : vector<19x36xbf16>, vector<36x128xbf16>, vector<19x128xf32> -> vector<19x128xf32>
    %c0_21 = arith.constant 0 : index
    %c0_22 = arith.constant 0 : index
    %28 = vector.load %arg9[%c0_21, %c0_22] : memref<19x1xf32, #tpu.memory_space<vmem>>, vector<19x1xf32>
    %29 = vector.broadcast %28 : vector<19x1xf32> to vector<19x128xf32>
    %30 = arith.addf %27, %29 : vector<19x128xf32>
    %cst_23 = arith.constant 0.000000e+00 : f32
    %31 = vector.broadcast %cst_23 : f32 to vector<19x128xf32>
    %32 = arith.maximumf %30, %31 : vector<19x128xf32>
    %33 = arith.truncf %32 : vector<19x128xf32> to vector<19x128xbf16>
    %c0_24 = arith.constant 0 : index
    %c0_25 = arith.constant 0 : index
    %34 = vector.load %arg10[%c0_24, %c0_25] : memref<2x19xbf16, #tpu.memory_space<vmem>>, vector<2x19xbf16>
    %cst_26 = arith.constant dense<0.000000e+00> : vector<2x128xf32>
    %35 = tpu.matmul %34, %33, %cst_26 {dimension_numbers = #tpu.dot_dimension_numbers<[1], [0], [0], [1], [0, 0, 1, 1], [], []>} : vector<2x19xbf16>, vector<19x128xbf16>, vector<2x128xf32> -> vector<2x128xf32>
    %c0_27 = arith.constant 0 : index
    %c0_28 = arith.constant 0 : index
    %36 = vector.load %arg11[%c0_27, %c0_28] : memref<2x1xf32, #tpu.memory_space<vmem>>, vector<2x1xf32>
    %37 = vector.broadcast %36 : vector<2x1xf32> to vector<2x128xf32>
    %38 = arith.addf %35, %37 : vector<2x128xf32>
    %c0_29 = arith.constant 0 : index
    %c0_30 = arith.constant 0 : index
    %39 = vector.load %arg12[%c0_29, %c0_30] : memref<2x128xf32, #tpu.memory_space<vmem>>, vector<2x128xf32>
    tpu.vector_store %arg12[%c0_29, %c0_30], %38 {strides = array<i32>} : memref<2x128xf32, #tpu.memory_space<vmem>>, vector<2x128xf32>,
    return
  }
  func.func @transform_0(%arg0: i32) -> (i32, i32) {
    %c0_i32 = arith.constant 0 : i32
    %c0_i32_0 = arith.constant 0 : i32
    return %c0_i32, %arg0 : i32, i32
  }
  func.func @transform_1(%arg0: i32) -> (i32, i32) {
    %c0_i32 = arith.constant 0 : i32
    %c0_i32_0 = arith.constant 0 : i32
    %c0_i32_1 = arith.constant 0 : i32
    return %c0_i32, %c0_i32_0 : i32, i32
  }
  func.func @transform_2(%arg0: i32) -> (i32, i32) {
    %c0_i32 = arith.constant 0 : i32
    %c0_i32_0 = arith.constant 0 : i32
    %c0_i32_1 = arith.constant 0 : i32
    return %c0_i32, %c0_i32_0 : i32, i32
  }
  func.func @transform_3(%arg0: i32) -> (i32, i32) {
    %c0_i32 = arith.constant 0 : i32
    %c0_i32_0 = arith.constant 0 : i32
    %c0_i32_1 = arith.constant 0 : i32
    return %c0_i32, %c0_i32_0 : i32, i32
  }
  func.func @transform_4(%arg0: i32) -> (i32, i32) {
    %c0_i32 = arith.constant 0 : i32
    %c0_i32_0 = arith.constant 0 : i32
    %c0_i32_1 = arith.constant 0 : i32
    return %c0_i32, %c0_i32_0 : i32, i32
  }
  func.func @transform_5(%arg0: i32) -> (i32, i32) {
    %c0_i32 = arith.constant 0 : i32
    %c0_i32_0 = arith.constant 0 : i32
    %c0_i32_1 = arith.constant 0 : i32
    return %c0_i32, %c0_i32_0 : i32, i32
  }
  func.func @transform_6(%arg0: i32) -> (i32, i32) {
    %c0_i32 = arith.constant 0 : i32
    %c0_i32_0 = arith.constant 0 : i32
    %c0_i32_1 = arith.constant 0 : i32
    return %c0_i32, %c0_i32_0 : i32, i32
  }
  func.func @transform_7(%arg0: i32) -> (i32, i32) {
    %c0_i32 = arith.constant 0 : i32
    %c0_i32_0 = arith.constant 0 : i32
    %c0_i32_1 = arith.constant 0 : i32
    return %c0_i32, %c0_i32_0 : i32, i32
  }
  func.func @transform_8(%arg0: i32) -> (i32, i32) {
    %c0_i32 = arith.constant 0 : i32
    %c0_i32_0 = arith.constant 0 : i32
    %c0_i32_1 = arith.constant 0 : i32
    return %c0_i32, %c0_i32_0 : i32, i32
  }
  func.func @transform_9(%arg0: i32) -> (i32, i32) {
    %c0_i32 = arith.constant 0 : i32
    %c0_i32_0 = arith.constant 0 : i32
    %c0_i32_1 = arith.constant 0 : i32
    return %c0_i32, %c0_i32_0 : i32, i32
  }
  func.func @transform_10(%arg0: i32) -> (i32, i32) {
    %c0_i32 = arith.constant 0 : i32
    %c0_i32_0 = arith.constant 0 : i32
    %c0_i32_1 = arith.constant 0 : i32
    return %c0_i32, %c0_i32_0 : i32, i32
  }
  func.func @transform_11(%arg0: i32) -> (i32, i32) {
    %c0_i32 = arith.constant 0 : i32
    %c0_i32_0 = arith.constant 0 : i32
    return %c0_i32, %arg0 : i32, i32
  }
}

</mosaic_0001>

<bundles_post_ra>
// kernel: tpu_custom_call.1
= control target key start
LH: loop header
LB: loop body
LE: loop exit
PB: predicated region body
PF: predicated region fallthrough
CT: control target
= control target key end

     0   :  { %vm100_vm0 = vcmask 1042432   ;;  %v863_v1 = vmov 0.0   ;;  %vm864_vm1 = vmmov 0   ;;  %vm90_vm2 = vcmask 48128   ;;  %s1096_s0 = inlined_call_operand.vmem [shape: f32[6,128], index: 0, kind: input, shape index: {}]   ;;  %s1097_s1 = inlined_call_operand.vmem [shape: bf16[40,6], index: 1, kind: input, shape index: {}]   ;;  %s1098_s2 = inlined_call_operand.vmem [shape: f32[40,1], index: 2, kind: input, shape index: {}]   ;;  %s1099_s3 = inlined_call_operand.vmem [shape: bf16[81,40], index: 3, kind: input, shape index: {}]   ;;  %s1100_s4 = inlined_call_operand.vmem [shape: f32[81,1], index: 4, kind: input, shape index: {}]   ;;  %s1101_s5 = inlined_call_operand.vmem [shape: bf16[36,81], index: 5, kind: input, shape index: {}]   ;;  %s1102_s6 = inlined_call_operand.vmem [shape: f32[36,1], index: 6, kind: input, shape index: {}]   ;;  %s1103_s7 = inlined_call_operand.vmem [shape: bf16[19,36], index: 7, kind: input, shape index: {}]   ;;  %s1104_s8 = inlined_call_operand.vmem [shape: f32[19,1], index: 8, kind: input, shape index: {}]   ;;  %s1105_s9 = inlined_call_operand.vmem [shape: bf16[2,19], index: 9, kind: input, shape index: {}]   ;;  %s1106_s10 = inlined_call_operand.vmem [shape: f32[2,1], index: 10, kind: input, shape index: {}]   ;;  %s1107_s11 = inlined_call_operand.hbm [shape: f32[2,128], index: 11, kind: output, shape index: {}]  }
   0x1   :  { %v40_v0 = vld [vmem:[%s1096_s0] sm:$0x3f]  ;;  %744 = vmatprep.subr.bf16.mxu0 %v863_v1  ;;  %746 = vmatprep.mubr.msk.bf16.mxu0 %vm864_vm1, %v863_v1  ;;  %v865_v6 = vmov 0   ;;  %v50_v7 = vld [vmem:[%s1098_s2 + $0x18] sm:$0xff]  ;;  %v49_v8 = vld [vmem:[%s1098_s2 + $0x10] sm:$0xff] }
   0x2   :  { %v41_v2 = vpack.c.bf16 %v40_v0, %v40_v0  ;;  %v827_v4 = vld [vmem:[%s1097_s1] sm:$0xff]   ;;  %825 = vset.pattern.permute.xlu0 %v865_v6  ;;  %826 = vset.pattern.permute.xlu1 %v865_v6  ;;  %v48_v10 = vld [vmem:[%s1098_s2 + $0x8] sm:$0xff]  ;;  %v189_v12 = vld [vmem:[%s1100_s4 + $0x50] sm:$0x1] }
   0x3   :  { %v51_v5 = vld [vmem:[%s1098_s2 + $0x20] sm:$0xff]  ;;  %69 = vperm.xlu1 %826, %v50_v7   ;;  %v828_v11 = vld [vmem:[%s1097_s1 + $0x8] sm:$0xff]   ;;  %v185_v15 = vld [vmem:[%s1100_s4 + $0x30] sm:$0xff] }
   0x4   :  { %v102_v3 = vsel %vm100_vm0, %v41_v2, 0  ;;  %74 = vperm.xlu0 %825, %v51_v5   ;;  %v47_v9 = vld [vmem:[%s1098_s2] sm:$0xff]  ;;  %v188_v14 = vld [vmem:[%s1100_s4 + $0x48] sm:$0xff] }
   0x5   :  { %745 = vmatpush3.bf16.msra.mxu0 %v102_v3  ;;  %v187_v13 = vld [vmem:[%s1100_s4 + $0x40] sm:$0xff] }
   0x6   :  { %776 = vmatprep.subr.bf16.mxu0 %v863_v1 }
   0x7   :  { %54 = vperm.xlu1 %826, %v47_v9  }
   0x8   :  { %747 = vmatmul.mubr.msk.bf16.vlgmr.msra.gmra.mxu0 %vm90_vm2, %v827_v4  ;;  %64 = vperm.xlu0 %825, %v49_v8  }
   0x9   :  { %750 = vmatprep.mubr.msk.bf16.mxu0 %vm864_vm1, %v863_v1 }
   0xb   :  { %242 = vperm.xlu1 %826, %v189_v12  }
   0xc   :  { %59 = vperm.xlu0 %825, %v48_v10  }
   0xf   :  { %237 = vperm.xlu1 %826, %v188_v14  }
  0x10   :  { %751 = vmatmul.mubr.msk.bf16.gmra.mxu0 %vm90_vm2, %v828_v11  ;;  %232 = vperm.xlu0 %825, %v187_v13  }
  0x11   :  { %754 = vmatprep.mubr.msk.bf16.mxu0 %vm864_vm1, %v863_v1 }
  0x12   :  { %16 = vsyncpa [#allocation3], 0  ;;  %v829_v16 = vld [vmem:[%s1097_s1 + $0x10] ss:$0 sps:$4 sm:$0xff]   ;;  %v186_v17 = vld [vmem:[%s1100_s4 + $0x38] sm:$0xff]  ;;  %vm273_vm3 = vcmask 326656  }
  0x13   :  { %v183_v18 = vld [vmem:[%s1100_s4 + $0x20] sm:$0xff]  ;;  %227 = vperm.xlu1 %826, %v186_v17   ;;  %v184_v19 = vld [vmem:[%s1100_s4 + $0x28] sm:$0xff]  ;;  %v181_v20 = vld [vmem:[%s1100_s4 + $0x10] sm:$0xff]  ;;  %vm292_vm4 = vcmask 1043456   ;;  %vm451_vm5 = vcmask 1040384   ;;  %vm441_vm6 = vcmask 662528  }
  0x14   :  { %222 = vperm.xlu0 %825, %v185_v15   ;;  %v182_v21 = vld [vmem:[%s1100_s4 + $0x18] sm:$0xff]  ;;  %v179_v22 = vld [vmem:[%s1100_s4] sm:$0xff]  ;;  %v180_v23 = vld [vmem:[%s1100_s4 + $0x8] sm:$0xff]  ;;  %vm550_vm7 = vcmask 293888   ;;  %vm557_vm8 = vcmask 1041408   ;;  %vm621_vm9 = vcmask 154624  }
  0x15   :  { %v402_v24 = vld [vmem:[%s1102_s6 + $0x20] sm:$0xf]  ;;  %v400_v25 = vld [vmem:[%s1102_s6 + $0x10] sm:$0xff]  ;;  %v401_v26 = vld [vmem:[%s1102_s6 + $0x18] sm:$0xff]  ;;  %s867_s25 = smov [#allocation2]  }
  0x16   :  { %v398_v27 = vld [vmem:[%s1102_s6] sm:$0xff]  ;;  %v399_v28 = vld [vmem:[%s1102_s6 + $0x8] sm:$0xff]  ;;  %v526_v29 = vld [vmem:[%s1104_s8 + $0x10] sm:$0x7]  ;;  %s677_s26 = sshll.u32 %s867_s25, 4  ;;  %s678_s26 = int_to_ptr.vmem [resolvable:$true] %s677_s26 }
  0x17   :  { %217 = vperm.xlu1 %826, %v184_v19   ;;  %v524_v30 = vld [vmem:[%s1104_s8] sm:$0xff]  ;;  %v525_v31 = vld [vmem:[%s1104_s8 + $0x8] sm:$0xff]  ;;  %v832_v3 = vld [vmem:[%s1099_s3 + $0x10] sm:$0xff]   ;;  %s841_s1 = scalar_lea.vmem %s678_s26, 32  ;;  %p846_p1 = scmp.lt.s32.totalorder %s678_s26, %s678_s26 }
  0x18   :  { %755 = vmatmul.mubr.msk.bf16.gmra.mxu0 %vm90_vm2, %v829_v16  ;;  %212 = vperm.xlu0 %825, %v183_v18   ;;  %v615_v32 = vld [vmem:[%s1106_s10] sm:$0x3]  ;;  %v831_v2 = vld [vmem:[%s1099_s3 + $0x8] sm:$0xff]   ;;  %v833_v4 = vld [vmem:[%s1099_s3 + $0x18] sm:$0xff]   ;;  %p842_p0 = scmp.ne.s32.totalorder %s678_s26, %s841_s1  ;;  %p847_p2 = scmp.lt.s32.totalorder %s841_s1, %s841_s1 }
  0x19   :  { %788 = vmatprep.mubr.msk.bf16.mxu0 %vm864_vm1, %v863_v1  ;;  %v830_v33 = vld [vmem:[%s1099_s3] sm:$0xff]   ;;  %v835_v7 = vld [vmem:[%s1099_s3 + $0x28] ss:$0 sps:$4 sm:$0x11]  }
  0x1a   :  { %764 = vmatprep.mubr.msk.bf16.mxu1 %vm273_vm3, %v830_v33  ;;  %v834_v5 = vld [vmem:[%s1099_s3 + $0x20] sm:$0xff]   ;;  %p848_p3 = por %p847_p2, %p846_p1 }
  0x1b   :  { %207 = vperm.xlu1 %826, %v182_v21  }
  0x1c   :  { %202 = vperm.xlu0 %825, %v181_v20   ;;  %p849_p4 = pnand %p848_p3, %p842_p0 }
  0x1f   :  { %197 = vperm.xlu1 %826, %v180_v23  }
  0x20   :  { %192 = vperm.xlu0 %825, %v179_v22  }
  0x23   :  { %415 = vperm.xlu1 %826, %v400_v25   ;;  %v453_v25 = vsel %vm451_vm5, 65535, %v865_v6 }
  0x24   :  { %425 = vperm.xlu0 %825, %v402_v24  }
  0x27   :  { %405 = vperm.xlu1 %826, %v398_v27  }
  0x28   :  { %420 = vperm.xlu0 %825, %v401_v26  }
  0x2b   :  { %539 = vperm.xlu1 %826, %v526_v29  }
  0x2c   :  { %410 = vperm.xlu0 %825, %v399_v28  }
  0x2f   :  { %534 = vperm.xlu1 %826, %v525_v31  }
  0x30   :  { %529 = vperm.xlu0 %825, %v524_v30  }
  0x34   :  { %618 = vperm.xlu0 %825, %v615_v32  }
  0x7e   :  { %v70_v43 = vpop.permute.xlu1 %69 }
  0x7f   :  { %v75_v37 = vpop.permute.xlu0 %74 }
  0x82   :  { %v55_v54 = vpop.permute.xlu1 %54 }
  0x83   :  { %v65_v41 = vpop.permute.xlu0 %64 }
  0x86   :  { %v243_v10 = vpop.permute.xlu1 %242 }
  0x87   :  { %v60_v49 = vpop.permute.xlu0 %59 }
  0x8a   :  { %v238_v14 = vpop.permute.xlu1 %237 }
  0x8b   :  { %v233_v16 = vpop.permute.xlu0 %232 }
  0x8e   :  { %v228_v19 = vpop.permute.xlu1 %227 }
  0x8f   :  { %v223_v22 = vpop.permute.xlu0 %222 }
  0x92   :  { %v218_v29 = vpop.permute.xlu1 %217 }
  0xc8   :  { %v138_v34 = vpop.f32.mrf.mxu0 }
  0xc9   :  { %v139_v56 = vadd.f32 %v138_v34, %v55_v54  ;;  %v213_v34 = vpop.permute.xlu0 %212 }
  0xca   :  { %v748_v35 = vpop.f32.mrf.mxu0 }
  0xcb   :  { %v160_v63 = vmax.f32 %v139_v56, 0.0 }
  0xcc   :  { %v141_v36 = vpop.f32.mrf.mxu0 }
  0xcd   :  { %v142_v51 = vadd.f32 %v141_v36, %v60_v49 }
  0xce   :  { %v749_v38 = vpop.f32.mrf.mxu0 }
  0xcf   :  { %v161_v60 = vmax.f32 %v142_v51, 0.0 }
  0xd0   :  { %v146_v39 = vpop.f32.mrf.mxu0 }
  0xd1   :  { %v147_v47 = vadd.f32 %v146_v39, %v65_v41  ;;  %v165_v0 = vpack.c.bf16 %v161_v60, %v160_v63  ;;  %v208_v41 = vpop.permute.xlu1 %207  ;;  %v836_v60 = vld [vmem:[%s1101_s5] sm:$0xff]  }
  0xd2   :  { %v752_v40 = vpop.f32.mrf.mxu0  ;;  %v839_v63 = vld [vmem:[%s1103_s7] sm:$0xff]  }
  0xd3   :  { %v162_v57 = vmax.f32 %v147_v47, 0.0 }
  0xd4   :  { %v149_v42 = vpop.f32.mrf.mxu0 }
  0xd5   :  { %v150_v45 = vadd.f32 %v149_v42, %v70_v43  ;;  %v203_v43 = vpop.permute.xlu0 %202  ;;  %v198_v49 = vpop.permute.xlu1 %197 }
  0xd6   :  { %v753_v44 = vpop.f32.mrf.mxu0 }
  0xd7   :  { %v163_v52 = vmax.f32 %v150_v45, 0.0 }
  0xd8   :  { %v154_v46 = vpop.f32.mrf.mxu0 }
  0xd9   :  { %v155_v48 = vadd.f32 %v154_v46, %v75_v37  ;;  %v166_v61 = vpack.c.bf16 %v163_v52, %v162_v57 }
  0xda   :  { %v756_v50 = vpop.f32.mrf.mxu0 }
  0xdb   :  { %v164_v53 = vmax.f32 %v155_v48, 0.0 }
  0xdc   :  { %v157_v55 = vpop.f32.mrf.mxu0 }
  0xdd   :  { %v167_v58 = vpack.c.bf16 %v164_v53, %v164_v53  ;;  %v193_v53 = vpop.permute.xlu0 %192 }
  0xde   :  { %v757_v59 = vpop.f32.mrf.mxu0 }
  0xdf   :  { %818 = vmatprep.subr.msk.bf16.mxu1 %vm292_vm4, %v167_v58  ;;  %v294_v62 = vsel %vm292_vm4, %v167_v58, 0 }
  0xe0   :  { %759 = vmatpush3.bf16.msra.mxu1 %v294_v62  ;;  %v838_v62 = vld [vmem:[%s1101_s5 + $0x10] ss:$0 sps:$4 sm:$0x33]  }
  0xe1   :  { %760 = vmatprep.subr.bf16.mxu1 %v166_v61 }
  0xe4   :  { %761 = vmatpush3.bf16.msra.mxu1 %v166_v61  ;;  %v837_v61 = vld [vmem:[%s1101_s5 + $0x8] sm:$0xff]  }
  0xe5   :  { %762 = vmatprep.subr.bf16.mxu1 %v165_v0 }
  0xe8   :  { %763 = vmatpush3.bf16.msra.mxu1 %v165_v0 }
  0xeb   :  { %765 = vmatmul.mubr.msk.bf16.vlgmr.msra.gmra.mxu1 %vm273_vm3, %v831_v2 }
  0xec   :  { %768 = vmatprep.mubr.msk.bf16.mxu1 %vm273_vm3, %v832_v3 }
  0xf3   :  { %769 = vmatmul.mubr.msk.bf16.gmra.mxu1 %vm273_vm3, %v833_v4  ;;  %v426_v4 = vpop.permute.xlu0 %425 }
  0xf4   :  { %772 = vmatprep.mubr.msk.bf16.mxu1 %vm273_vm3, %v834_v5 }
  0xfb   :  { %773 = vmatmul.mubr.msk.bf16.gmra.mxu1 %vm273_vm3, %v835_v7 }
  0xfc   :  { %806 = vmatprep.mubr.msk.bf16.mxu1 %vm550_vm7, %v839_v63 }
 0x1ab   :  { %v766_v8 = vpop.f32.mrf.mxu1 }
 0x1ac   :  { %v339_v47 = vadd.f32 %v766_v8, %v203_v43 }
 0x1ad   :  { %v330_v9 = vpop.f32.mrf.mxu1 }
 0x1ae   :  { %v378_v54 = vmax.f32 %v339_v47, 0.0  ;;  %v331_v55 = vadd.f32 %v330_v9, %v193_v53  ;;  %v421_v9 = vpop.permute.xlu0 %420 }
 0x1af   :  { %v767_v11 = vpop.f32.mrf.mxu1 }
 0x1b0   :  { %v342_v44 = vadd.f32 %v767_v11, %v208_v41  ;;  %v376_v58 = vmax.f32 %v331_v55, 0.0  ;;  %v416_v11 = vpop.permute.xlu1 %415 }
 0x1b1   :  { %v333_v12 = vpop.f32.mrf.mxu1 }
 0x1b2   :  { %v379_v50 = vmax.f32 %v342_v44, 0.0  ;;  %v334_v51 = vadd.f32 %v333_v12, %v198_v49 }
 0x1b3   :  { %v770_v13 = vpop.f32.mrf.mxu1 }
 0x1b4   :  { %v355_v35 = vadd.f32 %v770_v13, %v223_v22  ;;  %v388_v56 = vpack.c.bf16 %v379_v50, %v378_v54  ;;  %v377_v57 = vmax.f32 %v334_v51, 0.0  ;;  %v406_v22 = vpop.permute.xlu1 %405 }
 0x1b5   :  { %v346_v15 = vpop.f32.mrf.mxu1 }
 0x1b6   :  { %v382_v6 = vmax.f32 %v355_v35, 0.0  ;;  %v347_v42 = vadd.f32 %v346_v15, %v213_v34  ;;  %v387_v59 = vpack.c.bf16 %v377_v57, %v376_v58 }
 0x1b7   :  { %v771_v17 = vpop.f32.mrf.mxu1 }
 0x1b8   :  { %v358_v31 = vadd.f32 %v771_v17, %v228_v19  ;;  %v380_v48 = vmax.f32 %v347_v42, 0.0  ;;  %v411_v17 = vpop.permute.xlu0 %410  ;;  %v540_v34 = vpop.permute.xlu1 %539 }
 0x1b9   :  { %v349_v18 = vpop.f32.mrf.mxu1 }
 0x1ba   :  { %v383_v38 = vmax.f32 %v358_v31, 0.0  ;;  %v350_v39 = vadd.f32 %v349_v18, %v218_v29 }
 0x1bb   :  { %v774_v20 = vpop.f32.mrf.mxu1 }
 0x1bc   :  { %v371_v21 = vadd.f32 %v774_v20, %v243_v10  ;;  %v390_v45 = vpack.c.bf16 %v383_v38, %v382_v6  ;;  %v381_v46 = vmax.f32 %v350_v39, 0.0  ;;  %v530_v41 = vpop.permute.xlu0 %529 }
 0x1bd   :  { %v362_v23 = vpop.f32.mrf.mxu1 }
 0x1be   :  { %v386_v24 = vmax.f32 %v371_v21, 0.0  ;;  %v363_v28 = vadd.f32 %v362_v23, %v233_v16  ;;  %v389_v52 = vpack.c.bf16 %v381_v46, %v380_v48 }
 0x1bf   :  { %v775_v26 = vpop.f32.mrf.mxu1 }
 0x1c0   :  { %v392_v27 = vpack.c.bf16 %v386_v24, %v386_v24  ;;  %v384_v36 = vmax.f32 %v363_v28, 0.0  ;;  %v619_v53 = vpop.permute.xlu0 %618 }
 0x1c1   :  { %v365_v30 = vpop.f32.mrf.mxu1 }
 0x1c2   :  { %v455_v32 = vand.u32 %v453_v25, %v392_v27  ;;  %v366_v33 = vadd.f32 %v365_v30, %v238_v14 }
 0x1c4   :  { %v385_v37 = vmax.f32 %v366_v33, 0.0  ;;  %777 = vmatpush3.bf16.msra.mxu0 %v455_v32  ;;  %v840_v33 = vld [vmem:[%s1103_s7 + $0x8] ss:$0 sps:$4 sm:$0x33]  }
 0x1c5   :  { %778 = vmatprep.subr.bf16.mxu0 %v863_v1 }
 0x1c6   :  { %v391_v40 = vpack.c.bf16 %v385_v37, %v384_v36  ;;  %v866_v37 = vmov 65535  }
 0x1c7   :  { %v625_v38 = vsel %vm451_vm5, 4294967295, %v866_v37 }
 0x1c8   :  { %779 = vmatpush3.bf16.msra.mxu0 %v391_v40  ;;  %v626_v6 = vsel %vm557_vm8, %v625_v38, 0 }
 0x1c9   :  { %780 = vmatprep.subr.bf16.mxu0 %v863_v1 }
 0x1cc   :  { %781 = vmatpush3.bf16.msra.mxu0 %v390_v45  ;;  %v535_v45 = vpop.permute.xlu1 %534 }
 0x1cd   :  { %782 = vmatprep.subr.bf16.mxu0 %v863_v1 }
 0x1d0   :  { %783 = vmatpush3.bf16.msra.mxu0 %v389_v52  ;;  %v614_v52 = vld [vmem:[%s1105_s9] sm:$0x1] }
 0x1d1   :  { %784 = vmatprep.subr.bf16.mxu0 %v863_v1 }
 0x1d4   :  { %785 = vmatpush3.bf16.msra.mxu0 %v388_v56 }
 0x1d5   :  { %786 = vmatprep.subr.bf16.mxu0 %v863_v1 }
 0x1d8   :  { %787 = vmatpush3.bf16.msra.mxu0 %v387_v59 }
 0x1db   :  { %789 = vmatmul.mubr.msk.bf16.vlgmr.msra.gmra.mxu0 %vm441_vm6, %v836_v60 }
 0x1dc   :  { %792 = vmatprep.mubr.msk.bf16.mxu0 %vm864_vm1, %v863_v1 }
 0x1e3   :  { %793 = vmatmul.mubr.msk.bf16.gmra.mxu0 %vm441_vm6, %v837_v61 }
 0x1e4   :  { %796 = vmatprep.mubr.msk.bf16.mxu0 %vm864_vm1, %v863_v1 }
 0x1eb   :  { %797 = vmatmul.mubr.msk.bf16.gmra.mxu0 %vm441_vm6, %v838_v62 }
 0x29b   :  { %v491_v0 = vpop.f32.mrf.mxu0 }
 0x29c   :  { %v492_v24 = vadd.f32 %v491_v0, %v406_v22 }
 0x29d   :  { %v790_v2 = vpop.f32.mrf.mxu0 }
 0x29e   :  { %v513_v31 = vmax.f32 %v492_v24, 0.0 }
 0x29f   :  { %v494_v3 = vpop.f32.mrf.mxu0 }
 0x2a0   :  { %v495_v19 = vadd.f32 %v494_v3, %v411_v17 }
 0x2a1   :  { %v791_v5 = vpop.f32.mrf.mxu0 }
 0x2a2   :  { %v514_v28 = vmax.f32 %v495_v19, 0.0 }
 0x2a3   :  { %v499_v7 = vpop.f32.mrf.mxu0 }
 0x2a4   :  { %v500_v15 = vadd.f32 %v499_v7, %v416_v11  ;;  %v518_v32 = vpack.c.bf16 %v514_v28, %v513_v31 }
 0x2a5   :  { %v794_v8 = vpop.f32.mrf.mxu0 }
 0x2a6   :  { %v515_v25 = vmax.f32 %v500_v15, 0.0 }
 0x2a7   :  { %v502_v10 = vpop.f32.mrf.mxu0 }
 0x2a8   :  { %v503_v13 = vadd.f32 %v502_v10, %v421_v9 }
 0x2a9   :  { %v795_v12 = vpop.f32.mrf.mxu0 }
 0x2aa   :  { %v516_v20 = vmax.f32 %v503_v13, 0.0 }
 0x2ab   :  { %v507_v14 = vpop.f32.mrf.mxu0 }
 0x2ac   :  { %v508_v16 = vadd.f32 %v507_v14, %v426_v4  ;;  %v519_v29 = vpack.c.bf16 %v516_v20, %v515_v25 }
 0x2ad   :  { %v798_v18 = vpop.f32.mrf.mxu0 }
 0x2ae   :  { %v517_v21 = vmax.f32 %v508_v16, 0.0 }
 0x2af   :  { %v510_v23 = vpop.f32.mrf.mxu0 }
 0x2b0   :  { %v520_v26 = vpack.c.bf16 %v517_v21, %v517_v21 }
 0x2b1   :  { %v799_v27 = vpop.f32.mrf.mxu0 }
 0x2b2   :  { %819 = vmatprep.subr.msk.bf16.mxu1 %vm557_vm8, %v520_v26  ;;  %v559_v30 = vsel %vm557_vm8, %v520_v26, 0 }
 0x2b3   :  { %801 = vmatpush3.bf16.msra.mxu1 %v559_v30 }
 0x2b4   :  { %802 = vmatprep.subr.bf16.mxu1 %v519_v29 }
 0x2b7   :  { %803 = vmatpush3.bf16.msra.mxu1 %v519_v29 }
 0x2b8   :  { %804 = vmatprep.subr.bf16.mxu1 %v518_v32 }
 0x2bb   :  { %805 = vmatpush3.bf16.msra.mxu1 %v518_v32 }
 0x2bc   :  { %810 = vmatprep.subr.bf16.mxu1 %v863_v1 }
 0x2be   :  { %807 = vmatmul.mubr.msk.bf16.vlgmr.msra.gmra.mxu1 %vm550_vm7, %v840_v33 }
 0x2bf   :  { %814 = vmatprep.mubr.msk.bf16.mxu1 %vm864_vm1, %v863_v1 }
 0x37e   :  { %v808_v35 = vpop.f32.mrf.mxu1 }
 0x37f   :  { %v604_v36 = vadd.f32 %v808_v35, %v540_v34 }
 0x380   :  { %v595_v39 = vpop.f32.mrf.mxu1 }
 0x381   :  { %v611_v40 = vmax.f32 %v604_v36, 0.0  ;;  %v596_v44 = vadd.f32 %v595_v39, %v530_v41 }
 0x382   :  { %v809_v42 = vpop.f32.mrf.mxu1 }
 0x383   :  { %v613_v43 = vpack.c.bf16 %v611_v40, %v611_v40  ;;  %v609_v49 = vmax.f32 %v596_v44, 0.0 }
 0x384   :  { %v598_v46 = vpop.f32.mrf.mxu1 }
 0x385   :  { %v628_v47 = vand.u32 %v626_v6, %v613_v43  ;;  %v599_v48 = vadd.f32 %v598_v46, %v535_v45 }
 0x387   :  { %v610_v50 = vmax.f32 %v599_v48, 0.0  ;;  %811 = vmatpush3.bf16.msra.mxu1 %v628_v47 }
 0x388   :  { %812 = vmatprep.subr.bf16.mxu1 %v863_v1 }
 0x389   :  { %v612_v51 = vpack.c.bf16 %v610_v50, %v609_v49 }
 0x38b   :  { %813 = vmatpush3.bf16.msra.mxu1 %v612_v51 }
 0x38e   :  { %815 = vmatmul.mubr.msk.bf16.vlgmr.msra.gmra.mxu1 %vm621_vm9, %v614_v52 }
 0x44e   :  { %v664_v54 = vpop.f32.mrf.mxu1 }
 0x44f   :  { %v665_v55 = vadd.f32 %v664_v54, %v619_v53 }
 0x450   :  { %v816_v56 = vpop.f32.mrf.mxu1 }
 0x451   :  { %670 = vst [vmem:[#allocation2] sm:$0x3] %v665_v55 }
 0x452   :  { %v667_v57 = vpop.f32.mrf.mxu1 }
 0x453   :  { %852 = shalt.err (!%p849_p4)
}
 0x454   :  { %680 = dma.vmem_to_hbm [thread:$0]  %s678_s26, 32, %s1107_s11, [#allocation3]   ;;  %v817_v1 = vpop.f32.mrf.mxu1 }
 0x455   :  { %861 = dma.done.wait [#allocation3], 32  }
 0x456   :  { %862 = vsyncadd [#allocation3], 4294967264 }
 0x457   :  { %684 = vsyncpa [#allocation3], 1 }

</bundles_post_ra>
